<compile_context>
chip_gen: v6e
topology: v6e:2x2x1
jax: 0.10.0
libtpu: 0.0.40
codegen_flags: <defaults>
</compile_context>

<pallas_src>
import jax
import jax.numpy as jnp
from jax.experimental import pallas as pl
from jax.experimental.pallas import tpu as pltpu


_TARGET_BLOCK_BYTES = 4 << 20  # pipelining sweet spot (~85% HBM roofline at 1-2 MiB)


# --------------------------------------------------------------------------
# Kernels
# --------------------------------------------------------------------------
def _se_kernel(x_ref, w1_ref, b1_ref, w2_ref, b2_ref, o_ref):
    # x block: (TB, C, HW), lane-dense last dim. Squeeze with f32 accumulation.
    y = jnp.mean(x_ref[...], axis=2, dtype=jnp.float32)                      # (TB, C)
    # Excite: fc1 -> relu -> fc2 -> sigmoid (tiny; latency only).
    h = jnp.maximum(
        jnp.dot(y, w1_ref[...], preferred_element_type=jnp.float32) + b1_ref[...], 0.0)
    s = jax.nn.sigmoid(
        jnp.dot(h, w2_ref[...], preferred_element_type=jnp.float32) + b2_ref[...])
    # Scale: re-read the resident VMEM input block (no block-sized live temp).
    o_ref[...] = (x_ref[...] * s[:, :, None].astype(o_ref.dtype)).astype(o_ref.dtype)


def _se_squeeze_kernel(x_ref, y_ref):
    # x block: (1, TC, HW) -> per-channel mean (1, TC, 1), f32 accumulation.
    y_ref[...] = jnp.mean(x_ref[...], axis=2, keepdims=True, dtype=jnp.float32)


def _se_excite_kernel(y_ref, w1_ref, b1_ref, w2_ref, b2_ref, s_ref):
    # Whole (B, C, 1) pooled vector; tiny FCs.
    y = y_ref[:, :, 0]                                                       # (B, C)
    h = jnp.maximum(
        jnp.dot(y, w1_ref[...], preferred_element_type=jnp.float32) + b1_ref[...], 0.0)
    s = jax.nn.sigmoid(
        jnp.dot(h, w2_ref[...], preferred_element_type=jnp.float32) + b2_ref[...])
    s_ref[...] = s[:, :, None]


def _se_scale_kernel(x_ref, s_ref, o_ref):
    # x block (1, TC, HW), gate block (1, TC, 1) f32.
    o_ref[...] = (x_ref[...] * s_ref[...].astype(o_ref.dtype)).astype(o_ref.dtype)


# --------------------------------------------------------------------------
# Tiling / VMEM helpers
# --------------------------------------------------------------------------
def _vmem_capacity_bytes():
    try:
        cap = int(pltpu.get_tpu_info().vmem_capacity_bytes)
        if cap > 0:
            return cap
    except Exception:
        pass
    return 64 << 20  # conservative default: v7x per-TensorCore VMEM


def _vmem_limit(needed_bytes, capacity_bytes):
    # Never below what the blocks need; otherwise at least the 32 MiB default,
    # but leave a little physical headroom.
    limit = max(32 << 20, needed_bytes)
    limit = min(limit, max(needed_bytes, capacity_bytes - (2 << 20)))
    return int(limit)


def _choose_batch_tile(B, per_image_bytes, budget_bytes, target_block_bytes):
    """Largest batch tile near the pipelining sweet spot whose double-buffered
    in+out blocks fit the budget, preferring an even (>=4) number of steps."""
    fit_cap = max(1, budget_bytes // (4 * per_image_bytes))
    sweet_cap = max(1, target_block_bytes // per_image_bytes)
    tb_max = max(1, min(B, fit_cap, sweet_cap))

    best = None
    for t in range(tb_max, 0, -1):
        if B % t:
            continue
        if best is None:
            best = t
        steps = B // t
        if steps % 2 == 0 and steps >= 4:       # even & enough steps per TC
            return t
    for t in range(best, 0, -1):                # next best: even step count
        if B % t == 0 and (B // t) % 2 == 0:
            return t
    return best                                 # e.g. B == 1


def _choose_channel_tile(C, HW, itemsize, budget_bytes, target_block_bytes):
    per_chan_bytes = HW * itemsize
    cap = max(1, min(target_block_bytes // per_chan_bytes,
                     budget_bytes // (4 * per_chan_bytes)))
    cap = min(cap, C)
    best = None
    for t in range(cap, 0, -1):
        if C % t:
            continue
        if best is None:
            best = t
        if t % 8 == 0:                          # sublane-aligned block
            return t
    if best is None:
        best = C
    if best % 8 != 0 and best != C:
        # Keep the (8,128) block rule; prefer a small aligned divisor.
        # TODO(synk): extreme shapes (C not multiple of 8 AND huge HW) may
        # still exceed the budget here; would need an HW-tiled reduction pass.
        best = 8 if C % 8 == 0 else C
    return best


# --------------------------------------------------------------------------
# Wrapper
# --------------------------------------------------------------------------
def se_layer(x, w1, b1, w2, b2, *, force_channel_tiling=False,
             target_block_bytes=_TARGET_BLOCK_BYTES):
    """x: (B, C, H, W). Returns (B, C, H, W)."""
    B, C, H, W = x.shape
    Cr = w1.shape[1]
    HW = H * W
    itemsize = jnp.dtype(x.dtype).itemsize

    x2 = x.reshape(B, C, HW)        # lane-dense spatial axis (free for NCHW-contig)
    b1r = b1.reshape(1, Cr)
    b2r = b2.reshape(1, C)

    capacity = _vmem_capacity_bytes()
    budget = max(24 << 20, (capacity * 3) // 4 - (4 << 20))   # gen-aware budget

    per_image_bytes = C * HW * itemsize
    weight_bytes = (2 * C * Cr + C + Cr) * 4

    use_fallback = force_channel_tiling or (
        4 * per_image_bytes + weight_bytes + (1 << 20) > budget)

    if not use_fallback:
        # ------------------ main path: batch-tiled single pass ------------------
        TB = _choose_batch_tile(B, per_image_bytes, budget, target_block_bytes)
        num_steps = B // TB
        block_bytes = TB * per_image_bytes
        needed = 4 * block_bytes + weight_bytes + (2 << 20)
        vmem_limit = _vmem_limit(needed, capacity)

        cost = pl.CostEstimate(
            flops=2 * B * C * HW + 4 * B * C * Cr,
            transcendentals=B * C,
            bytes_accessed=2 * B * C * HW * itemsize + weight_bytes,
        )

        out2 = pl.pallas_call(
            _se_kernel,
            out_shape=jax.ShapeDtypeStruct((B, C, HW), x.dtype),
            grid_spec=pltpu.PrefetchScalarGridSpec(
                num_scalar_prefetch=0,
                grid=(num_steps,),
                in_specs=[
                    pl.BlockSpec((TB, C, HW), lambda b: (b, 0, 0)),
                    pl.BlockSpec((C, Cr), lambda b: (0, 0)),
                    pl.BlockSpec((1, Cr), lambda b: (0, 0)),
                    pl.BlockSpec((Cr, C), lambda b: (0, 0)),
                    pl.BlockSpec((1, C), lambda b: (0, 0)),
                ],
                out_specs=pl.BlockSpec((TB, C, HW), lambda b: (b, 0, 0)),
            ),
            compiler_params=pltpu.CompilerParams(
                dimension_semantics=("parallel",),
                vmem_limit_bytes=vmem_limit,
            ),
            cost_estimate=cost,
        )(x2, w1, b1r, w2, b2r)
        return out2.reshape(B, C, H, W)

    # ------------- fallback: channel-tiled, three small pallas_calls -------------
    TC = _choose_channel_tile(C, HW, itemsize, budget, target_block_bytes)
    nc = C // TC
    block_bytes = TC * HW * itemsize
    needed = 4 * block_bytes + weight_bytes + (2 << 20)
    vmem_limit = _vmem_limit(needed, capacity)
    cp = pltpu.CompilerParams(
        dimension_semantics=("parallel", "parallel"),
        vmem_limit_bytes=vmem_limit,
    )

    # Pass 1: squeeze -> per-channel means, stored as (B, C, 1) f32.
    y = pl.pallas_call(
        _se_squeeze_kernel,
        out_shape=jax.ShapeDtypeStruct((B, C, 1), jnp.float32),
        grid_spec=pltpu.PrefetchScalarGridSpec(
            num_scalar_prefetch=0,
            grid=(B, nc),
            in_specs=[pl.BlockSpec((1, TC, HW), lambda b, c: (b, c, 0))],
            out_specs=pl.BlockSpec((1, TC, 1), lambda b, c: (b, c, 0)),
        ),
        compiler_params=cp,
    )(x2)

    # Pass 2: excite (tiny FCs) on the whole pooled vector.
    gate = pl.pallas_call(
        _se_excite_kernel,
        out_shape=jax.ShapeDtypeStruct((B, C, 1), jnp.float32),
    )(y, w1, b1r, w2, b2r)

    # Pass 3: scale x by the per-channel gate.
    out2 = pl.pallas_call(
        _se_scale_kernel,
        out_shape=jax.ShapeDtypeStruct((B, C, HW), x.dtype),
        grid_spec=pltpu.PrefetchScalarGridSpec(
            num_scalar_prefetch=0,
            grid=(B, nc),
            in_specs=[
                pl.BlockSpec((1, TC, HW), lambda b, c: (b, c, 0)),
                pl.BlockSpec((1, TC, 1), lambda b, c: (b, c, 0)),
            ],
            out_specs=pl.BlockSpec((1, TC, HW), lambda b, c: (b, c, 0)),
        ),
        compiler_params=cp,
    )(x2, gate)
    return out2.reshape(B, C, H, W)


def se_layer_ref(x, w1, b1, w2, b2):
    # Pure-JAX reference for correctness checking.
    y = jnp.mean(x, axis=(2, 3))                       # (B, C)
    h = jnp.maximum(y @ w1 + b1, 0.0)                  # (B, C//r)
    s = jax.nn.sigmoid(h @ w2 + b2)                    # (B, C)
    return x * s[:, :, None, None]


if __name__ == "__main__":
    B, C, H, W = 2, 32, 16, 16
    reduction = 16
    Cr = C // reduction  # 2

    key = jax.random.PRNGKey(0)
    kx, k1, k2, k3, k4 = jax.random.split(key, 5)

    x = jax.random.normal(kx, (B, C, H, W), dtype=jnp.float32)
    # Synthetic parameters, shapes from nn.Linear(C, C//r) / nn.Linear(C//r, C).
    w1 = jax.random.normal(k1, (C, Cr), dtype=jnp.float32) * (1.0 / jnp.sqrt(C))
    b1 = jax.random.normal(k2, (Cr,), dtype=jnp.float32) * 0.01
    w2 = jax.random.normal(k3, (Cr, C), dtype=jnp.float32) * (1.0 / jnp.sqrt(Cr))
    b2 = jax.random.normal(k4, (C,), dtype=jnp.float32) * 0.01

    ref = se_layer_ref(x, w1, b1, w2, b2)

    # Main (batch-tiled) path.
    out = jax.block_until_ready(se_layer(x, w1, b1, w2, b2))
    assert out.shape == (B, C, H, W)
    assert jnp.allclose(out, ref, atol=1e-5, rtol=1e-5)

    # Exercise the channel-tiled fallback path (used for feature maps whose
    # single-image block would not fit the per-generation VMEM budget).
    out_fb = jax.block_until_ready(
        se_layer(x, w1, b1, w2, b2, force_channel_tiling=True,
                 target_block_bytes=8 * 1024))
    assert jnp.allclose(out_fb, ref, atol=1e-5, rtol=1e-5)

    print("KERNEL_OK")
</pallas_src>

<mosaic_0001>
module attributes {stable_mosaic.version = 11 : i64} {
  func.func @_se_kernel(%arg0: i32, %arg1: memref<1x32x256xf32, #tpu.memory_space<vmem>>, %arg2: memref<32x2xf32, #tpu.memory_space<vmem>>, %arg3: memref<1x2xf32, #tpu.memory_space<vmem>>, %arg4: memref<2x32xf32, #tpu.memory_space<vmem>>, %arg5: memref<1x32xf32, #tpu.memory_space<vmem>>, %arg6: memref<1x32x256xf32, #tpu.memory_space<vmem>>) attributes {dimension_semantics = [#tpu.dimension_semantics<parallel>], iteration_bounds = array<i64: 2>, scalar_prefetch = 0 : i64, scratch_operands = 0 : i64, tpu.core_type = #tpu.core_type<tc>, window_params = [{transform_indices = @transform_0, window_bounds = array<i64: 1, 32, 256>}, {pipeline_mode = #tpu.pipeline_mode<synchronous>, transform_indices = @transform_1, window_bounds = array<i64: 32, 2>}, {pipeline_mode = #tpu.pipeline_mode<synchronous>, transform_indices = @transform_2, window_bounds = array<i64: 1, 2>}, {pipeline_mode = #tpu.pipeline_mode<synchronous>, transform_indices = @transform_3, window_bounds = array<i64: 2, 32>}, {pipeline_mode = #tpu.pipeline_mode<synchronous>, transform_indices = @transform_4, window_bounds = array<i64: 1, 32>}, {transform_indices = @transform_5, window_bounds = array<i64: 1, 32, 256>}]} {
    %c0 = arith.constant 0 : index
    %c0_0 = arith.constant 0 : index
    %c0_1 = arith.constant 0 : index
    %0 = vector.load %arg1[%c0, %c0_0, %c0_1] : memref<1x32x256xf32, #tpu.memory_space<vmem>>, vector<1x32x256xf32>
    %cst = arith.constant dense<0.000000e+00> : vector<1x32xf32>
    %1 = vector.multi_reduction <add>, %0, %cst [2] : vector<1x32x256xf32> to vector<1x32xf32>
    %cst_2 = arith.constant 2.560000e+02 : f32
    %2 = vector.broadcast %cst_2 : f32 to vector<1x32xf32>
    %3 = arith.divf %1, %2 : vector<1x32xf32>
    %c0_3 = arith.constant 0 : index
    %c0_4 = arith.constant 0 : index
    %4 = vector.load %arg2[%c0_3, %c0_4] : memref<32x2xf32, #tpu.memory_space<vmem>>, vector<32x2xf32>
    %cst_5 = arith.constant dense<0.000000e+00> : vector<1x2xf32>
    %5 = tpu.matmul %3, %4, %cst_5 {dimension_numbers = #tpu.dot_dimension_numbers<[1], [0], [0], [1], [0, 0, 1, 1], [], []>} : vector<1x32xf32>, vector<32x2xf32>, vector<1x2xf32> -> vector<1x2xf32>
    %c0_6 = arith.constant 0 : index
    %c0_7 = arith.constant 0 : index
    %6 = vector.load %arg3[%c0_6, %c0_7] : memref<1x2xf32, #tpu.memory_space<vmem>>, vector<1x2xf32>
    %7 = arith.addf %5, %6 : vector<1x2xf32>
    %cst_8 = arith.constant 0.000000e+00 : f32
    %8 = vector.broadcast %cst_8 : f32 to vector<1x2xf32>
    %9 = arith.maximumf %7, %8 : vector<1x2xf32>
    %c0_9 = arith.constant 0 : index
    %c0_10 = arith.constant 0 : index
    %10 = vector.load %arg4[%c0_9, %c0_10] : memref<2x32xf32, #tpu.memory_space<vmem>>, vector<2x32xf32>
    %cst_11 = arith.constant dense<0.000000e+00> : vector<1x32xf32>
    %11 = tpu.matmul %9, %10, %cst_11 {dimension_numbers = #tpu.dot_dimension_numbers<[1], [0], [0], [1], [0, 0, 1, 1], [], []>} : vector<1x2xf32>, vector<2x32xf32>, vector<1x32xf32> -> vector<1x32xf32>
    %c0_12 = arith.constant 0 : index
    %c0_13 = arith.constant 0 : index
    %12 = vector.load %arg5[%c0_12, %c0_13] : memref<1x32xf32, #tpu.memory_space<vmem>>, vector<1x32xf32>
    %13 = arith.addf %11, %12 : vector<1x32xf32>
    %14 = arith.negf %13 : vector<1x32xf32>
    %15 = math.exp %14 : vector<1x32xf32>
    %cst_14 = arith.constant 1.000000e+00 : f32
    %16 = vector.broadcast %cst_14 : f32 to vector<1x32xf32>
    %17 = arith.addf %16, %15 : vector<1x32xf32>
    %18 = arith.divf %16, %17 : vector<1x32xf32>
    %c0_15 = arith.constant 0 : index
    %c0_16 = arith.constant 0 : index
    %c0_17 = arith.constant 0 : index
    %19 = vector.load %arg1[%c0_15, %c0_16, %c0_17] : memref<1x32x256xf32, #tpu.memory_space<vmem>>, vector<1x32x256xf32>
    %20 = vector.shape_cast %18 : vector<1x32xf32> to vector<1x32x1xf32>
    %21 = vector.broadcast %20 : vector<1x32x1xf32> to vector<1x32x256xf32>
    %22 = arith.mulf %19, %21 : vector<1x32x256xf32>
    %c0_18 = arith.constant 0 : index
    %c0_19 = arith.constant 0 : index
    %c0_20 = arith.constant 0 : index
    %23 = vector.load %arg6[%c0_18, %c0_19, %c0_20] : memref<1x32x256xf32, #tpu.memory_space<vmem>>, vector<1x32x256xf32>
    tpu.vector_store %arg6[%c0_18, %c0_19, %c0_20], %22 {strides = array<i32>} : memref<1x32x256xf32, #tpu.memory_space<vmem>>, vector<1x32x256xf32>,
    return
  }
  func.func @transform_0(%arg0: i32) -> (i32, i32, i32) {
    %c0_i32 = arith.constant 0 : i32
    %c0_i32_0 = arith.constant 0 : i32
    %c0_i32_1 = arith.constant 0 : i32
    return %arg0, %c0_i32, %c0_i32_0 : i32, i32, i32
  }
  func.func @transform_1(%arg0: i32) -> (i32, i32) {
    %c0_i32 = arith.constant 0 : i32
    %c0_i32_0 = arith.constant 0 : i32
    %c0_i32_1 = arith.constant 0 : i32
    return %c0_i32, %c0_i32_0 : i32, i32
  }
  func.func @transform_2(%arg0: i32) -> (i32, i32) {
    %c0_i32 = arith.constant 0 : i32
    %c0_i32_0 = arith.constant 0 : i32
    %c0_i32_1 = arith.constant 0 : i32
    return %c0_i32, %c0_i32_0 : i32, i32
  }
  func.func @transform_3(%arg0: i32) -> (i32, i32) {
    %c0_i32 = arith.constant 0 : i32
    %c0_i32_0 = arith.constant 0 : i32
    %c0_i32_1 = arith.constant 0 : i32
    return %c0_i32, %c0_i32_0 : i32, i32
  }
  func.func @transform_4(%arg0: i32) -> (i32, i32) {
    %c0_i32 = arith.constant 0 : i32
    %c0_i32_0 = arith.constant 0 : i32
    %c0_i32_1 = arith.constant 0 : i32
    return %c0_i32, %c0_i32_0 : i32, i32
  }
  func.func @transform_5(%arg0: i32) -> (i32, i32, i32) {
    %c0_i32 = arith.constant 0 : i32
    %c0_i32_0 = arith.constant 0 : i32
    %c0_i32_1 = arith.constant 0 : i32
    return %arg0, %c0_i32, %c0_i32_0 : i32, i32, i32
  }
}

</mosaic_0001>

<bundles_post_ra>
// kernel: tpu_custom_call.1
= control target key start
LH: loop header
LB: loop body
LE: loop exit
PB: predicated region body
PF: predicated region fallthrough
CT: control target
= control target key end

     0   :  { %10 = vsyncpa [#allocation3], 0  ;;  %s1028_s0 = inlined_call_operand.hbm [shape: f32[2,32,256], index: 0, kind: input, shape index: {}]   ;;  %s1029_s1 = inlined_call_operand.vmem [shape: f32[32,2], index: 1, kind: input, shape index: {}]   ;;  %s1030_s2 = inlined_call_operand.vmem [shape: f32[1,2], index: 2, kind: input, shape index: {}]   ;;  %s1031_s3 = inlined_call_operand.vmem [shape: f32[2,32], index: 3, kind: input, shape index: {}]   ;;  %s1032_s4 = inlined_call_operand.vmem [shape: f32[1,32], index: 4, kind: input, shape index: {}]   ;;  %s1033_s5 = inlined_call_operand.hbm [shape: f32[2,32,256], index: 5, kind: output, shape index: {}]  }
   0x1   :  { %12 = vsyncpa [#allocation3 + $0x1], 0 }
   0x2   :  { %13 = vsyncpa [#allocation4], 0 }
   0x3   :  { %15 = vsyncpa [#allocation4 + $0x1], 0  ;;  %s817_s18 = smov 0   ;;  %s819_s19 = smov 0  }
   0x4   :  { %s821_s20 = smov 0   ;;  %s823_s21 = smov 0  }
   0x5 LB: > { %s838_s22 = sadd.s32 4294967295, %s777_s21   ;;  %s586_s23 = sadd.s32 4294967294, %s777_s21   ;;  %s777_s21 = sphi %s823_s21, %s1048_s21   ;;  %s773_s20 = sphi %s821_s20, %s1047_s20   ;;  %s769_s19 = sphi %s819_s19, %s1046_s19   ;;  %s765_s18 = sphi %s817_s18, %s1045_s18  }
   0x6   : > { %s842_s24 = sadd.s32 1, %s777_s21   ;;  %s28_s25 = sadd.s32 1, %s773_s20 }
   0x7   : > { %s25_s26 = ssub.s32 %s777_s21, %s842_s24  ;;  %p35_p0 = scmp.ne.s32.totalorder %s773_s20, %s769_s19 }
   0x8   : > { %p26_p1 = scmp.eq.s32.totalorder %s25_s26, 0  ;;  %p36_p2 = scmp.eq.s32.totalorder %s777_s21, 0 }
   0x9   : > { %p41_p3 = scmp.ne.s32.totalorder %s769_s19, %s765_s18  ;;  %p42_p4 = scmp.eq.s32.totalorder %s838_s22, 0 }
   0xa   : > { %s854_s27 = scalar_select %p26_p1, %s773_s20, %s28_s25  }
   0xb   : > { %p856_p5 = por %p36_p2, %p35_p0  ;;  %p860_p6 = por %p42_p4, %p41_p3 }
   0xc   : > { %p149_p7 = scmp.eq.s32.totalorder %s838_s22, 1  ;;  %p155_p8 = scmp.eq.s32.totalorder %s586_s23, 1 }
   0xd   : > { %s1037_s29 = scalar_select %p860_p6, 1, 0 }
   0xe   : > { %p641_p10 = scmp.lt.s32.totalorder %s777_s21, 2  ;;  %p867_p11 = por %p149_p7, %p35_p0 }
   0xf   : > { %p871_p12 = por %p155_p8, %p41_p3  ;;  %s187_s7 = sand.u32 1, %s773_s20  }
  0x10   : > { %s1038_s30 = scalar_select %p867_p11, 1, 0 }
  0x11   : > { %s1039_s6 = scalar_select %p871_p12, 1, 0 }
  0x12   : > { %s604_s8 = sshll.u32 %s777_s21, 10  ;;  %s589_s9 = sshll.u32 %s187_s7, 6 }
  0x13   : > { %s880_s12 = scalar_lea.hbm %s1028_s0, %s604_s8  ;;  %s191_s13 = scalar_lea.vmem [#allocation2], %s589_s9 }
  0x14   : > { %s198_s14 = sshll.u32 %s191_s13, 4  ;;  %p884_p13 = pnand %p641_p10, %p856_p5  ;;  %s888_s14 = int_to_ptr.vmem [resolvable:$true] %s198_s14 }
  0x15   : > { %s890_s16 = scalar_lea.sflag [#allocation3], %s187_s7  ;;  %s685_s17 = scalar_lea.hbm %s880_s12, 1024 }
  0x16   : > { %p686_p0 = scmp.ne.s32.totalorder %s880_s12, %s685_s17  ;;  %p687_p1 = pneg %p884_p13 }
  0x17   : > { %s690_s26 = scalar_lea.hbm %s1028_s0, 2048  ;;  %p691_p4 = scmp.lt.s32.totalorder %s880_s12, %s1028_s0 }
  0x18   : > { %p688_p2 = pnand %p687_p1, %p686_p0  ;;  %p692_p5 = scmp.lt.s32.totalorder %s690_s26, %s685_s17 }
  0x1a   : > { %p689_p3 = pneg %p688_p2  ;;  %p693_p7 = por %p692_p5, %p691_p4 }
  0x1c   : > { %p694_p8 = pnand %p693_p7, %p689_p3 }
  0x1e   : > { %697 = shalt.err (!%p694_p8)
}
  0x1f   : > { %s698_s7 = scalar_lea.vmem %s888_s14, 1024  ;;  %s779_s9 = smov [#allocation2]  }
  0x20   : > { %p699_p10 = scmp.ne.s32.totalorder %s888_s14, %s698_s7  ;;  %s703_s10 = sshll.u32 %s779_s9, 4  ;;  %s704_s10 = int_to_ptr.vmem [resolvable:$false] %s703_s10 }
  0x21   : > { %s705_s11 = scalar_lea.vmem %s704_s10, 2048  ;;  %p706_p2 = scmp.lt.s32.totalorder %s888_s14, %s704_s10 }
  0x22   : > { %p701_p9 = pnand %p699_p10, %p687_p1  ;;  %p707_p12 = scmp.lt.s32.totalorder %s705_s11, %s698_s7 }
  0x24   : > { %p702_p0 = pneg %p701_p9  ;;  %p708_p11 = por %p707_p12, %p706_p2 }
  0x26   : > { %p709_p6 = pnand %p708_p11, %p702_p0 }
  0x28   : > { %712 = shalt.err (!%p709_p6)
}
  0x29   : > { %s780_s13 = smov 256   ;;  %s781_s17 = smov 16  }
  0x2a   : > { %636 = dma.hbm_to_vmem [thread:$0]  (!%p884_p13), %s880_s12, 1024, %s888_s14, %s890_s16, %s780_s13, %s780_s13, %s781_s17  }
  0x2b   : > { %p592_p9 = scmp.ge.s32.totalorder %s777_s21, 1  ;;  %p206_p1 = scmp.lt.s32.totalorder %s777_s21, 3 }
  0x2d   : > { %p207_p3 = pnand %p592_p9, %p206_p1 }
  0x2e   : > { %s914_s23 = sand.u32 (!%p207_p3), 1, %s769_s19   ;;  %p1041_p6 = scmp.ne.s32.totalorder (!%p207_p3), %s1037_s29, 0 }
  0x2f   : > { %210 = sbr.rel (%p207_p3) target bundleno = 770 (0x302), region = 40  ;;  %s593_s25 = sshll.u32 (!%p207_p3), %s914_s23, 6 }
  0x30   : > { %s213_s26 = scalar_lea.sflag (!%p207_p3), [#allocation3], %s914_s23  ;;  %s216_s28 = scalar_lea.vmem (!%p207_p3), [#allocation2], %s593_s25 }
  0x34   : > { %756 = dma.done.wait (%p1041_p6), %s213_s26, 1024  }
  0x35   : > { %758 = vsyncadd (%p1041_p6), %s213_s26, 4294966272  ;;  %v924_v0 = vld [vmem:[%s216_s28] sm:$0xff]  ;;  %v926_v1 = vld [vmem:[%s216_s28 + $0x8] sm:$0xff]  ;;  %v782_v12 = vmov 0.0   ;;  %vm783_vm0 = vmmov 0   ;;  %v277_v17 = vlaneseq  ;;  %vm288_vm1 = vcmask 130112  }
  0x36   : > { %v928_v2 = vld [vmem:[%s216_s28 + $0x20] sm:$0xff]  ;;  %v251_v3 = vadd.f32 %v926_v1, %v924_v0  ;;  %v932_v4 = vld [vmem:[%s216_s28 + $0x28] sm:$0xff]  ;;  %v934_v5 = vld [vmem:[%s216_s28 + $0x10] sm:$0xff]  ;;  %613 = vmatprep.subr.mxu0 %v782_v12  ;;  %624 = vmatprep.subr.mxu1 %v782_v12  ;;  %vm295_vm2 = vcmask 195712   ;;  %vm302_vm3 = vcmask 261312   ;;  %vm304_vm4 = vcmask 261120  }
  0x37   : > { %v936_v6 = vld [vmem:[%s216_s28 + $0x18] sm:$0xff]  ;;  %v257_v7 = vadd.f32 %v932_v4, %v928_v2  ;;  %v940_v8 = vld [vmem:[%s216_s28 + $0x30] sm:$0xff]  ;;  %v269_v15 = vld [vmem:[%s1029_s1 + $0x8] sm:$0xff]  ;;  %621 = vmatprep.mubr.msk.f32.mxu0 %vm783_vm0, %v782_v12  ;;  %626 = vmatprep.mubr.msk.f32.mxu1 %vm783_vm0, %v782_v12  ;;  %v278_v18 = vand.u32 127, %v277_v17  ;;  %v280_v19 = vshrl.u32 %v277_v17, 7  ;;  %vm384_vm5 = vcmask 1041408  }
  0x38   : > { %v942_v9 = vld [vmem:[%s216_s28 + $0x38] sm:$0xff]  ;;  %252 = vadd.xlane.f32.xlu0 %v251_v3  ;;  %v254_v10 = vadd.f32 %v936_v6, %v934_v5  ;;  %v270_v14 = vld [vmem:[%s1029_s1 + $0x10] sm:$0xff]  ;;  %v268_v16 = vld [vmem:[%s1029_s1] sm:$0xff]  ;;  %vm380_vm6 = vcmask 15360   ;;  %s242_s29 = scalar_lea.vmem [#allocation5], %s593_s25  ;;  %s605_s14 = sshll.u32 %s838_s22, 10 }
  0x39   : > { %258 = vadd.xlane.f32.xlu1 %v257_v7  ;;  %v260_v11 = vadd.f32 %v942_v9, %v940_v8  ;;  %v271_v13 = vld [vmem:[%s1029_s1 + $0x18] sm:$0xff]  ;;  %v283_v20 = vadd.s32 4294967288, %v278_v18  ;;  %v290_v22 = vadd.s32 4294967280, %v278_v18  ;;  %v297_v23 = vadd.s32 4294967272, %v278_v18  ;;  %v378_v42 = vld [vmem:[%s1031_s3] sm:$0x3]  ;;  %s983_s16 = scalar_lea.hbm %s1033_s5, %s605_s14 }
  0x3a   : > { %614 = vmatpush3.msra.mxu0 %v271_v13  ;;  %v281_v25 = vsub.s32 %v278_v18, %v280_v19  ;;  %625 = vmatpush3.msk.msra.mxu1 %vm384_vm5, %v378_v42  ;;  %v272_v43 = vld [vmem:[%s1030_s2] sm:$0x1]  ;;  %v466_v55 = vsub.s32 0, %v280_v19  ;;  %s513_s12 = sshll.u32 %s242_s29, 4  ;;  %s500_s22 = scalar_lea.sflag [#allocation4], %s914_s23  ;;  %s978_s12 = int_to_ptr.vmem [resolvable:$true] %s513_s12 }
  0x3b   : > { %615 = vmatprep.subr.mxu0 %v782_v12  ;;  %v286_v27 = vsub.s32 %v283_v20, %v280_v19  ;;  %v293_v28 = vsub.s32 %v290_v22, %v280_v19  ;;  %v300_v31 = vsub.s32 %v297_v23, %v280_v19  ;;  %v379_v48 = vld [vmem:[%s1032_s4] sm:$0x1]  ;;  %s713_s8 = scalar_lea.vmem %s978_s12, 1024  ;;  %p1042_p12 = scmp.ne.s32.totalorder %s1038_s30, 0 }
  0x3c   : > { %255 = vadd.xlane.f32.xlu0 %v254_v10  ;;  %616 = vmatpush3.msra.mxu0 %v270_v14  ;;  %p714_p11 = scmp.ne.s32.totalorder %s978_s12, %s713_s8  ;;  %s784_s7 = smov [#allocation5]  }
  0x3d   : > { %261 = vadd.xlane.f32.xlu1 %v260_v11  ;;  %617 = vmatprep.subr.mxu0 %v782_v12  ;;  %s717_s9 = sshll.u32 %s784_s7, 4  ;;  %s718_s9 = int_to_ptr.vmem [resolvable:$false] %s717_s9 }
  0x3e   : > { %618 = vmatpush3.msra.mxu0 %v269_v15  ;;  %p715_p13 = pnand %p714_p11, %p1042_p12  ;;  %s719_s10 = scalar_lea.vmem %s718_s9, 2048 }
  0x3f   : > { %619 = vmatprep.subr.mxu0 %v782_v12  ;;  %p720_p5 = scmp.lt.s32.totalorder %s978_s12, %s718_s9  ;;  %p721_p7 = scmp.lt.s32.totalorder %s719_s10, %s713_s8 }
  0x40   : > { %620 = vmatpush3.msra.mxu0 %v268_v16  ;;  %p716_p4 = pneg %p715_p13 }
  0x41   : > { %p722_p8 = por %p721_p7, %p720_p5 }
  0x43   : > { %p723_p10 = pnand %p722_p8, %p716_p4 }
  0xc1   : > { %v253_v21 = vpop.xlane.xlu0 %252 }
  0xc2   : > { %v259_v24 = vpop.xlane.xlu1 %258  ;;  %v264_v26 = vmul.f32 0.00390625, %v253_v21 }
  0xc3   : > { %v266_v29 = vmul.f32 0.00390625, %v259_v24 }
  0xc4   : > { %v282_v35 = vrot.slane %v264_v26, %v281_v25 }
  0xc5   : > { %v256_v30 = vpop.xlane.xlu0 %255  ;;  %v294_v37 = vrot.slane %v266_v29, %v293_v28 }
  0xc6   : > { %v265_v32 = vmul.f32 0.00390625, %v256_v30  ;;  %v262_v33 = vpop.xlane.xlu1 %261 }
  0xc7   : > { %v267_v34 = vmul.f32 0.00390625, %v262_v33 }
  0xc8   : > { %v287_v36 = vrot.slane %v265_v32, %v286_v27 }
  0xc9   : > { %v301_v38 = vrot.slane %v267_v34, %v300_v31 }
  0xca   : > { %v289_v39 = vsel %vm288_vm1, %v287_v36, %v282_v35 }
  0xcb   : > { %v296_v40 = vsel %vm295_vm2, %v294_v37, %v289_v39 }
  0xcc   : > { %v303_v41 = vsel %vm302_vm3, %v301_v38, %v296_v40 }
  0xcd   : > { %622 = vmatmul.mubr.msk.f32.vlgmr.msra.gmra.mxu0 %vm304_vm4, %v303_v41 }
 0x18d   : > { %v373_v44 = vpop.f32.mrf.mxu0 }
 0x18e   : > { %v374_v45 = vadd.f32 %v373_v44, %v272_v43 }
 0x18f   : > { %v623_v46 = vpop.f32.mrf.mxu0 }
 0x190   : > { %v377_v47 = vmax.f32 %v374_v45, 0.0 }
 0x192   : > { %627 = vmatmul.mubr.msk.f32.vlgmr.msra.gmra.mxu1 %vm380_vm6, %v377_v47 }
 0x252   : > { %v454_v49 = vpop.f32.mrf.mxu1 }
 0x253   : > { %v455_v50 = vadd.f32 %v454_v49, %v379_v48 }
 0x254   : > { %v628_v51 = vpop.f32.mrf.mxu1 }
 0x255   : > { %v598_v52 = vmul.f32 -1.442695, %v455_v50 }
 0x257   : > { %681 = vpow2.f32 %v598_v52 }
 0x264   : > { %v682_v53 = vpop.eup %681 }
 0x265   : > { %v461_v54 = vadd.f32 1.0, %v682_v53 }
 0x267   : > { %683 = vrcp.f32 %v461_v54 }
 0x274   : > { %v684_v56 = vpop.eup %683 }
 0x275   : > { %v467_v57 = vrot.slane %v684_v56, %v466_v55 }
 0x277   : > { %473 = vbcast.lane.b32.xlu1 %v467_v57, 264  ;;  %469 = vbcast.lane.b32.xlu0 %v467_v57, 256 }
 0x27b   : > { %477 = vbcast.lane.b32.xlu1 %v467_v57, 272 }
 0x27f   : > { %481 = vbcast.lane.b32.xlu1 %v467_v57, 280 }
 0x2e9   : > { %v474_v58 = vpop.permute.xlu1 %473  ;;  %v470_v59 = vpop.permute.xlu0 %469 }
 0x2ea   : > { %v485_v60 = vmul.f32 %v474_v58, %v934_v5  ;;  %v486_v61 = vmul.f32 %v474_v58, %v936_v6  ;;  %v483_v62 = vmul.f32 %v470_v59, %v924_v0  ;;  %v484_v63 = vmul.f32 %v470_v59, %v926_v1 }
 0x2ec   : > { %493 = vst [vmem:[%s242_s29 + $0x10] sm:$0xff] %v485_v60  ;;  %494 = vst [vmem:[%s242_s29 + $0x18] sm:$0xff] %v486_v61 }
 0x2ed   : > { %491 = vst [vmem:[%s242_s29] sm:$0xff] %v483_v62  ;;  %492 = vst [vmem:[%s242_s29 + $0x8] sm:$0xff] %v484_v63  ;;  %v478_v3 = vpop.permute.xlu1 %477 }
 0x2ee   : > { %v487_v7 = vmul.f32 %v478_v3, %v928_v2  ;;  %v488_v5 = vmul.f32 %v478_v3, %v932_v4 }
 0x2f0   : > { %495 = vst [vmem:[%s242_s29 + $0x20] sm:$0xff] %v487_v7  ;;  %496 = vst [vmem:[%s242_s29 + $0x28] sm:$0xff] %v488_v5 }
 0x2f1   : > { %v482_v0 = vpop.permute.xlu1 %481 }
 0x2f2   : > { %v489_v1 = vmul.f32 %v482_v0, %v940_v8  ;;  %v490_v2 = vmul.f32 %v482_v0, %v942_v9 }
 0x2f4   : > { %497 = vst [vmem:[%s242_s29 + $0x30] sm:$0xff] %v489_v1  ;;  %498 = vst [vmem:[%s242_s29 + $0x38] sm:$0xff] %v490_v2 }
 0x2f5   : > { %726 = shalt.err (!%p723_p10)
}
 0x2f6   : > { %s727_s11 = scalar_lea.hbm %s983_s16, 1024  ;;  %s731_s26 = scalar_lea.hbm %s1033_s5, 2048 }
 0x2f7   : > { %p728_p0 = scmp.ne.s32.totalorder %s983_s16, %s727_s11  ;;  %p732_p1 = scmp.lt.s32.totalorder %s983_s16, %s1033_s5 }
 0x2f8   : > { %p733_p3 = scmp.lt.s32.totalorder %s731_s26, %s727_s11 }
 0x2f9   : > { %p729_p2 = pnand %p728_p0, %p1042_p12 }
 0x2fa   : > { %p734_p6 = por %p733_p3, %p732_p1 }
 0x2fb   : > { %p730_p9 = pneg %p729_p2 }
 0x2fd   : > { %p735_p11 = pnand %p734_p6, %p730_p9 }
 0x2ff   : > { %738 = shalt.err (!%p735_p11)
}
 0x300   : > { %s785_s14 = smov 256   ;;  %s786_s25 = smov 16  }
 0x301   : > { %631 = dma.vmem_to_hbm [thread:$0]  (%p1042_p12), %s978_s12, 1024, %s983_s16, %s500_s22, %s785_s14, %s785_s14, %s786_s25  }
 0x302 PF: > { %s528_s15 = sand.u32 1, %s765_s18   ;;  %p1043_p13 = scmp.ne.s32.totalorder %s1039_s6, 0 }
 0x303   : > { %p1044_p4 = scmp.ge.s32.totalorder %s777_s21, 2  ;;  %s529_s8 = scalar_lea.sflag [#allocation4], %s528_s15 }
 0x305   : > { %p638_p5 = pnand %p1044_p4, %p1043_p13 }
 0x307   : > { %p639_p7 = pneg %p638_p5 }
 0x309   : > { %760 = dma.done.wait (%p639_p7), %s529_s8, 1024  }
 0x30a   : > { %762 = vsyncadd (%p639_p7), %s529_s8, 4294966272  ;;  %p18_p8 = scmp.ge.s32.totalorder %s842_s24, 4   ;;  %s1045_s18 = smov %s769_s19 }
 0x30b   : > { %s1046_s19 = smov %s773_s20  ;;  %s1047_s20 = smov %s854_s27 }
 0x30c   : > { %s1048_s21 = smov %s842_s24  ;;  %20 = sbr.rel (!%p18_p8) target bundleno = 5 (0x5), region = 85 }
 0x311   :  { %534 = vsyncpa [#allocation3], 1 }
 0x312   :  { %536 = vsyncpa [#allocation3 + $0x1], 1 }
 0x313   :  { %537 = vsyncpa [#allocation4], 1 }
 0x314   :  { %539 = vsyncpa [#allocation4 + $0x1], 1 }

</bundles_post_ra>
